<compile_context>
chip_gen: v5e
topology: v5e:2x2
jax: 0.10.0
libtpu: 0.0.40
codegen_flags: <defaults>
</compile_context>

<pallas_src>
import math

import jax
import jax.numpy as jnp
from jax.experimental import pallas as pl
from jax.experimental.pallas import tpu as pltpu


def _round_up(a: int, b: int) -> int:
    return ((a + b - 1) // b) * b


def _fused_gcn_kernel(x_ref, adj_ref, w_ref, b_ref, o_ref,
                      h_ref, sup_ref, acc_ref):
    """Grid = (L, I, K); one (TM, TK) adj tile per step.

    x_ref   : (TK, F_pad)       bf16  node-feature tile (valid at l==0, i==0, step k)
    adj_ref : (TM, TK)          bf16  adjacency tile
    w_ref   : (1, F_pad, F_pad) bf16  this layer's weight
    b_ref   : (1, 1, F_pad)     f32   this layer's bias
    o_ref   : (TM, F_pad)       f32   output row tile (written on last layer only)
    h_ref   : (N_pad, F_pad)    bf16  VMEM-resident activations h_l
    sup_ref : (N_pad, F_pad)    bf16  VMEM-resident support = h_{l-1} @ W_l
    acc_ref : (TM, F_pad)       f32   K-reduction accumulator
    """
    l = pl.program_id(0)
    i = pl.program_id(1)
    k = pl.program_id(2)
    nl = pl.num_programs(0)
    nk = pl.num_programs(2)

    tm = acc_ref.shape[0]
    tk = adj_ref.shape[1]
    k_off = pl.multiple_of(k * tk, tk)

    # ---- Layer prologue (spread over the K steps of the first row tile):
    #      support[k-tile] = h_{l-1}[k-tile] @ W_l   (h_{-1} := x). ----
    @pl.when(i == 0)
    def _():
        @pl.when(l == 0)
        def _():
            sup_ref[pl.ds(k_off, tk), :] = jnp.dot(
                x_ref[...], w_ref[0],
                preferred_element_type=jnp.float32).astype(sup_ref.dtype)

        @pl.when(l > 0)
        def _():
            sup_ref[pl.ds(k_off, tk), :] = jnp.dot(
                h_ref[pl.ds(k_off, tk), :], w_ref[0],
                preferred_element_type=jnp.float32).astype(sup_ref.dtype)

    # ---- K reduction: acc += adj[i-tile, k-tile] @ support[k-tile]. ----
    @pl.when(k == 0)
    def _():
        acc_ref[...] = jnp.zeros_like(acc_ref)

    acc_ref[...] += jnp.dot(
        adj_ref[...], sup_ref[pl.ds(k_off, tk), :],
        preferred_element_type=jnp.float32)

    # ---- Epilogue: bias + leaky_relu(0.25); stash h row tile / emit output. ----
    @pl.when(k == nk - 1)
    def _():
        out = acc_ref[...] + b_ref[0]
        out = jnp.where(out >= 0.0, out, 0.25 * out)

        @pl.when(l < nl - 1)
        def _():
            i_off = pl.multiple_of(i * tm, tm)
            h_ref[pl.ds(i_off, tm), :] = out.astype(h_ref.dtype)

        @pl.when(l == nl - 1)
        def _():
            o_ref[...] = out.astype(o_ref.dtype)


def gcn_e_forward(x, adj, params, *, tile=512, compute_dtype=jnp.bfloat16):
    """Fused GCN_E forward: h_l = leaky_relu(adj @ (h_{l-1} @ W_l) + b_l, 0.25)."""
    n, f_in = x.shape
    num_layers = len(params)
    f_dims = [f_in] + [w.shape[1] for (w, _) in params]
    f_out = f_dims[-1]
    f_pad = _round_up(max(f_dims), 128)

    # Tile sizes: lane dim multiple of 128, sublane multiple of 8, and the tile
    # must divide N_pad.  Clamp to the (padded) problem size for small graphs.
    t = _round_up(min(tile, _round_up(n, 128)), 128)
    n_pad = _round_up(n, t)
    tm = tk = t
    nib = n_pad // tm
    nkb = n_pad // tk
    grid = (num_layers, nib, nkb)
    last_layer = num_layers - 1

    # ---- Pad & pack operands (zero padding keeps real rows/cols exact). ----
    x_p = jnp.zeros((n_pad, f_pad), compute_dtype).at[:n, :f_in].set(
        x.astype(compute_dtype))
    adj_p = jnp.zeros((n_pad, n_pad), compute_dtype).at[:n, :n].set(
        adj.astype(compute_dtype))
    w_p = jnp.zeros((num_layers, f_pad, f_pad), compute_dtype)
    b_p = jnp.zeros((num_layers, 1, f_pad), jnp.float32)
    for li, (w, b) in enumerate(params):
        w_p = w_p.at[li, :w.shape[0], :w.shape[1]].set(w.astype(compute_dtype))
        b_p = b_p.at[li, 0, :b.shape[0]].set(b.astype(jnp.float32))

    # ---- Data-dependent index maps. ----
    def x_map(l, i, k):
        # Only advance x tiles during (layer 0, row tile 0); pinned afterwards
        # so x is DMA'd from HBM exactly once.
        return (jnp.where(jnp.logical_and(l == 0, i == 0), k, nkb - 1), 0)

    def out_map(l, i, k):
        # Only sweep output row tiles on the last layer: intermediate layers
        # never write back to HBM (one lane-dense f32 output pass total).
        return (jnp.where(l == last_layer, i, 0), 0)

    # ---- VMEM budget from tile sizes (double-buffered inputs/outputs). ----
    csz = jnp.dtype(compute_dtype).itemsize
    est_vmem = (2 * tk * f_pad * csz              # x tiles
                + 2 * tm * tk * csz               # adj tiles
                + 2 * f_pad * f_pad * csz         # W
                + 2 * 8 * f_pad * 4               # b (sublane-padded)
                + 2 * tm * f_pad * 4              # output tiles
                + 2 * n_pad * f_pad * csz         # h + support scratch
                + tm * f_pad * 4)                 # accumulator
    vmem_limit = int(min(48 << 20, max(32 << 20, 2 * est_vmem)))

    # ---- Advisory cost estimate (unpadded per-layer work). ----
    flops = 0
    for li in range(num_layers):
        flops += 2 * n * f_dims[li] * f_dims[li + 1]   # h @ W
        flops += 2 * n * n * f_dims[li + 1]            # adj @ support
    bytes_accessed = (num_layers * n_pad * n_pad * csz      # adj streamed per layer
                      + n_pad * f_pad * csz                 # x (read once)
                      + num_layers * f_pad * f_pad * csz    # W
                      + n_pad * f_pad * 4)                  # single output pass

    out_p = pl.pallas_call(
        _fused_gcn_kernel,
        out_shape=jax.ShapeDtypeStruct((n_pad, f_pad), jnp.float32),
        grid_spec=pltpu.PrefetchScalarGridSpec(
            num_scalar_prefetch=0,
            grid=grid,
            in_specs=[
                pl.BlockSpec((tk, f_pad), x_map),                           # x
                pl.BlockSpec((tm, tk), lambda l, i, k: (i, k)),             # adj
                pl.BlockSpec((1, f_pad, f_pad), lambda l, i, k: (l, 0, 0)), # W_l
                pl.BlockSpec((1, 1, f_pad), lambda l, i, k: (l, 0, 0)),     # b_l
            ],
            out_specs=pl.BlockSpec((tm, f_pad), out_map),
            scratch_shapes=[
                pltpu.VMEM((n_pad, f_pad), compute_dtype),   # h (resident)
                pltpu.VMEM((n_pad, f_pad), compute_dtype),   # support (resident)
                pltpu.VMEM((tm, f_pad), jnp.float32),        # accumulator
            ],
        ),
        compiler_params=pltpu.CompilerParams(
            # Row axis can't be "parallel": h/support are shared VMEM state
            # across row tiles and layers in the fused design.
            dimension_semantics=("arbitrary", "arbitrary", "arbitrary"),
            vmem_limit_bytes=vmem_limit,
        ),
        cost_estimate=pl.CostEstimate(
            flops=flops, transcendentals=0, bytes_accessed=bytes_accessed),
    )(x_p, adj_p, w_p, b_p)

    return out_p[:n, :f_out]


def init_gc_params(key, in_features, out_features):
    """Matches GraphConvolution.reset_parameters: uniform(-stdv, stdv), stdv=1/sqrt(in)."""
    stdv = 1.0 / math.sqrt(in_features)
    kw, kb = jax.random.split(key)
    w = jax.random.uniform(kw, (in_features, out_features), jnp.float32, -stdv, stdv)
    b = jax.random.uniform(kb, (out_features,), jnp.float32, -stdv, stdv)
    return w, b


def reference_forward(x, adj, params, compute_dtype=jnp.bfloat16):
    """Pure-JAX reference mirroring the kernel's bf16-input / f32-accumulate math."""
    def leaky(v):
        return jnp.where(v >= 0.0, v, 0.25 * v)
    adj_c = adj.astype(compute_dtype)
    h = x.astype(compute_dtype)
    out = None
    for w, b in params:
        sup = jnp.dot(h, w.astype(compute_dtype),
                      preferred_element_type=jnp.float32).astype(compute_dtype)
        out = leaky(jnp.dot(adj_c, sup, preferred_element_type=jnp.float32)
                    + b.astype(jnp.float32))
        h = out.astype(compute_dtype)
    return out


if __name__ == "__main__":
    key = jax.random.PRNGKey(0)
    k_x, k_adj, k1, k2, k3 = jax.random.split(key, 5)

    N = 8            # number of graph nodes
    in_dim = 16
    hgcn_dim = (32, 32, 32)

    x = jax.random.normal(k_x, (N, in_dim), jnp.float32)
    # symmetric, row-normalized adjacency
    a = jax.random.uniform(k_adj, (N, N), jnp.float32)
    adj = (a + a.T) * 0.5 + jnp.eye(N, dtype=jnp.float32)
    adj = adj / jnp.sum(adj, axis=1, keepdims=True)

    params = (
        init_gc_params(k1, in_dim, hgcn_dim[0]),
        init_gc_params(k2, hgcn_dim[0], hgcn_dim[1]),
        init_gc_params(k3, hgcn_dim[1], hgcn_dim[2]),
    )

    out = gcn_e_forward(x, adj, params)
    out = jax.block_until_ready(out)

    ref = reference_forward(x, adj, params)
    assert out.shape == (N, hgcn_dim[2]), out.shape
    assert jnp.allclose(out, ref, atol=1e-2, rtol=1e-2), (
        f"mismatch vs reference: max abs err {jnp.max(jnp.abs(out - ref))}")

    print("KERNEL_OK")
</pallas_src>

<mosaic_0001>
module attributes {stable_mosaic.version = 11 : i64} {
  func.func @_fused_gcn_kernel(%arg0: i32, %arg1: i32, %arg2: i32, %arg3: memref<128x128xbf16, #tpu.memory_space<vmem>>, %arg4: memref<128x128xbf16, #tpu.memory_space<vmem>>, %arg5: memref<1x128x128xbf16, #tpu.memory_space<vmem>>, %arg6: memref<1x1x128xf32, #tpu.memory_space<vmem>>, %arg7: memref<128x128xf32, #tpu.memory_space<vmem>>, %arg8: memref<128x128xbf16, #tpu.memory_space<vmem>>, %arg9: memref<128x128xbf16, #tpu.memory_space<vmem>>, %arg10: memref<128x128xf32, #tpu.memory_space<vmem>>) attributes {dimension_semantics = [#tpu.dimension_semantics<arbitrary>, #tpu.dimension_semantics<arbitrary>, #tpu.dimension_semantics<arbitrary>], iteration_bounds = array<i64: 3, 1, 1>, scalar_prefetch = 0 : i64, scratch_operands = 3 : i64, tpu.core_type = #tpu.core_type<tc>, window_params = [{transform_indices = @transform_0, window_bounds = array<i64: 128, 128>}, {transform_indices = @transform_1, window_bounds = array<i64: 128, 128>}, {transform_indices = @transform_2, window_bounds = array<i64: 1, 128, 128>}, {transform_indices = @transform_3, window_bounds = array<i64: 1, 1, 128>}, {transform_indices = @transform_4, window_bounds = array<i64: 128, 128>}]} {
    %c128_i32 = arith.constant 128 : i32
    %0 = arith.muli %arg2, %c128_i32 : i32
    %1 = tpu.assume_multiple %0, 128 : i32
    %c0_i32 = arith.constant 0 : i32
    %2 = arith.cmpi eq, %arg1, %c0_i32 : i32
    %3 = arith.extui %2 : i1 to i32
    %c0_i32_0 = arith.constant 0 : i32
    %4 = arith.cmpi ne, %3, %c0_i32_0 : i32
    scf.if %4 {
      %c0_i32_11 = arith.constant 0 : i32
      %18 = arith.cmpi eq, %arg0, %c0_i32_11 : i32
      %19 = arith.extui %18 : i1 to i32
      %c0_i32_12 = arith.constant 0 : i32
      %20 = arith.cmpi ne, %19, %c0_i32_12 : i32
      scf.if %20 {
        %c0_15 = arith.constant 0 : index
        %c0_16 = arith.constant 0 : index
        %24 = vector.load %arg3[%c0_15, %c0_16] : memref<128x128xbf16, #tpu.memory_space<vmem>>, vector<128x128xbf16>
        %c0_17 = arith.constant 0 : index
        %c0_18 = arith.constant 0 : index
        %c0_19 = arith.constant 0 : index
        %25 = vector.load %arg5[%c0_17, %c0_18, %c0_19] : memref<1x128x128xbf16, #tpu.memory_space<vmem>>, vector<1x128x128xbf16>
        %26 = vector.shape_cast %25 : vector<1x128x128xbf16> to vector<128x128xbf16>
        %cst_20 = arith.constant dense<0.000000e+00> : vector<128x128xf32>
        %27 = tpu.matmul %24, %26, %cst_20 {dimension_numbers = #tpu.dot_dimension_numbers<[1], [0], [0], [1], [0, 0, 1, 1], [], []>} : vector<128x128xbf16>, vector<128x128xbf16>, vector<128x128xf32> -> vector<128x128xf32>
        %28 = arith.truncf %27 : vector<128x128xf32> to vector<128x128xbf16>
        %29 = arith.index_cast %1 : i32 to index
        %c0_21 = arith.constant 0 : index
        %30 = vector.load %arg9[%29, %c0_21] : memref<128x128xbf16, #tpu.memory_space<vmem>>, vector<128x128xbf16>
        tpu.vector_store %arg9[%29, %c0_21], %28 {strides = array<i32>} : memref<128x128xbf16, #tpu.memory_space<vmem>>, vector<128x128xbf16>,
      } else {
      }
      %c0_i32_13 = arith.constant 0 : i32
      %21 = arith.cmpi sgt, %arg0, %c0_i32_13 : i32
      %22 = arith.extui %21 : i1 to i32
      %c0_i32_14 = arith.constant 0 : i32
      %23 = arith.cmpi ne, %22, %c0_i32_14 : i32
      scf.if %23 {
        %24 = arith.index_cast %1 : i32 to index
        %c0_15 = arith.constant 0 : index
        %25 = vector.load %arg8[%24, %c0_15] : memref<128x128xbf16, #tpu.memory_space<vmem>>, vector<128x128xbf16>
        %c0_16 = arith.constant 0 : index
        %c0_17 = arith.constant 0 : index
        %c0_18 = arith.constant 0 : index
        %26 = vector.load %arg5[%c0_16, %c0_17, %c0_18] : memref<1x128x128xbf16, #tpu.memory_space<vmem>>, vector<1x128x128xbf16>
        %27 = vector.shape_cast %26 : vector<1x128x128xbf16> to vector<128x128xbf16>
        %cst_19 = arith.constant dense<0.000000e+00> : vector<128x128xf32>
        %28 = tpu.matmul %25, %27, %cst_19 {dimension_numbers = #tpu.dot_dimension_numbers<[1], [0], [0], [1], [0, 0, 1, 1], [], []>} : vector<128x128xbf16>, vector<128x128xbf16>, vector<128x128xf32> -> vector<128x128xf32>
        %29 = arith.truncf %28 : vector<128x128xf32> to vector<128x128xbf16>
        %30 = arith.index_cast %1 : i32 to index
        %c0_20 = arith.constant 0 : index
        %31 = vector.load %arg9[%30, %c0_20] : memref<128x128xbf16, #tpu.memory_space<vmem>>, vector<128x128xbf16>
        tpu.vector_store %arg9[%30, %c0_20], %29 {strides = array<i32>} : memref<128x128xbf16, #tpu.memory_space<vmem>>, vector<128x128xbf16>,
      } else {
      }
    } else {
    }
    %c0_i32_1 = arith.constant 0 : i32
    %5 = arith.cmpi eq, %arg2, %c0_i32_1 : i32
    %6 = arith.extui %5 : i1 to i32
    %c0_i32_2 = arith.constant 0 : i32
    %7 = arith.cmpi ne, %6, %c0_i32_2 : i32
    scf.if %7 {
      %cst_11 = arith.constant 0.000000e+00 : f32
      %18 = vector.broadcast %cst_11 : f32 to vector<128x128xf32>
      %c0_12 = arith.constant 0 : index
      %c0_13 = arith.constant 0 : index
      %19 = vector.load %arg10[%c0_12, %c0_13] : memref<128x128xf32, #tpu.memory_space<vmem>>, vector<128x128xf32>
      tpu.vector_store %arg10[%c0_12, %c0_13], %18 {strides = array<i32>} : memref<128x128xf32, #tpu.memory_space<vmem>>, vector<128x128xf32>,
    } else {
    }
    %c0 = arith.constant 0 : index
    %c0_3 = arith.constant 0 : index
    %8 = vector.load %arg10[%c0, %c0_3] : memref<128x128xf32, #tpu.memory_space<vmem>>, vector<128x128xf32>
    %c0_4 = arith.constant 0 : index
    %c0_5 = arith.constant 0 : index
    %9 = vector.load %arg4[%c0_4, %c0_5] : memref<128x128xbf16, #tpu.memory_space<vmem>>, vector<128x128xbf16>
    %10 = arith.index_cast %1 : i32 to index
    %c0_6 = arith.constant 0 : index
    %11 = vector.load %arg9[%10, %c0_6] : memref<128x128xbf16, #tpu.memory_space<vmem>>, vector<128x128xbf16>
    %cst = arith.constant dense<0.000000e+00> : vector<128x128xf32>
    %12 = tpu.matmul %9, %11, %cst {dimension_numbers = #tpu.dot_dimension_numbers<[1], [0], [0], [1], [0, 0, 1, 1], [], []>} : vector<128x128xbf16>, vector<128x128xbf16>, vector<128x128xf32> -> vector<128x128xf32>
    %13 = arith.addf %8, %12 : vector<128x128xf32>
    %c0_7 = arith.constant 0 : index
    %c0_8 = arith.constant 0 : index
    %14 = vector.load %arg10[%c0_7, %c0_8] : memref<128x128xf32, #tpu.memory_space<vmem>>, vector<128x128xf32>
    tpu.vector_store %arg10[%c0_7, %c0_8], %13 {strides = array<i32>} : memref<128x128xf32, #tpu.memory_space<vmem>>, vector<128x128xf32>,
    %c0_i32_9 = arith.constant 0 : i32
    %15 = arith.cmpi eq, %arg2, %c0_i32_9 : i32
    %16 = arith.extui %15 : i1 to i32
    %c0_i32_10 = arith.constant 0 : i32
    %17 = arith.cmpi ne, %16, %c0_i32_10 : i32
    scf.if %17 {
      %c0_11 = arith.constant 0 : index
      %c0_12 = arith.constant 0 : index
      %18 = vector.load %arg10[%c0_11, %c0_12] : memref<128x128xf32, #tpu.memory_space<vmem>>, vector<128x128xf32>
      %c0_13 = arith.constant 0 : index
      %c0_14 = arith.constant 0 : index
      %c0_15 = arith.constant 0 : index
      %19 = vector.load %arg6[%c0_13, %c0_14, %c0_15] : memref<1x1x128xf32, #tpu.memory_space<vmem>>, vector<1x1x128xf32>
      %20 = vector.shape_cast %19 : vector<1x1x128xf32> to vector<1x128xf32>
      %21 = vector.broadcast %20 : vector<1x128xf32> to vector<128x128xf32>
      %22 = arith.addf %18, %21 : vector<128x128xf32>
      %cst_16 = arith.constant 0.000000e+00 : f32
      %23 = vector.broadcast %cst_16 : f32 to vector<128x128xf32>
      %24 = arith.cmpf oge, %22, %23 : vector<128x128xf32>
      %cst_17 = arith.constant 2.500000e-01 : f32
      %25 = vector.broadcast %cst_17 : f32 to vector<128x128xf32>
      %26 = arith.mulf %25, %22 : vector<128x128xf32>
      %27 = arith.select %24, %22, %26 : vector<128x128xi1>, vector<128x128xf32>
      %c2_i32 = arith.constant 2 : i32
      %28 = arith.cmpi slt, %arg0, %c2_i32 : i32
      %29 = arith.extui %28 : i1 to i32
      %c0_i32_18 = arith.constant 0 : i32
      %30 = arith.cmpi ne, %29, %c0_i32_18 : i32
      scf.if %30 {
        %c128_i32_21 = arith.constant 128 : i32
        %34 = arith.muli %arg1, %c128_i32_21 : i32
        %35 = tpu.assume_multiple %34, 128 : i32
        %36 = arith.truncf %27 : vector<128x128xf32> to vector<128x128xbf16>
        %37 = arith.index_cast %35 : i32 to index
        %c0_22 = arith.constant 0 : index
        %38 = vector.load %arg8[%37, %c0_22] : memref<128x128xbf16, #tpu.memory_space<vmem>>, vector<128x128xbf16>
        tpu.vector_store %arg8[%37, %c0_22], %36 {strides = array<i32>} : memref<128x128xbf16, #tpu.memory_space<vmem>>, vector<128x128xbf16>,
      } else {
      }
      %c2_i32_19 = arith.constant 2 : i32
      %31 = arith.cmpi eq, %arg0, %c2_i32_19 : i32
      %32 = arith.extui %31 : i1 to i32
      %c0_i32_20 = arith.constant 0 : i32
      %33 = arith.cmpi ne, %32, %c0_i32_20 : i32
      scf.if %33 {
        %c0_21 = arith.constant 0 : index
        %c0_22 = arith.constant 0 : index
        %34 = vector.load %arg7[%c0_21, %c0_22] : memref<128x128xf32, #tpu.memory_space<vmem>>, vector<128x128xf32>
        tpu.vector_store %arg7[%c0_21, %c0_22], %27 {strides = array<i32>} : memref<128x128xf32, #tpu.memory_space<vmem>>, vector<128x128xf32>,
      } else {
      }
    } else {
    }
    return
  }
  func.func @transform_0(%arg0: i32, %arg1: i32, %arg2: i32) -> (i32, i32) {
    %c0_i32 = arith.constant 0 : i32
    %0 = arith.cmpi eq, %arg0, %c0_i32 : i32
    %c0_i32_0 = arith.constant 0 : i32
    %1 = arith.cmpi eq, %arg1, %c0_i32_0 : i32
    %2 = arith.andi %0, %1 : i1
    %c0_i32_1 = arith.constant 0 : i32
    %3 = arith.select %2, %arg2, %c0_i32_1 : i32
    %c0_i32_2 = arith.constant 0 : i32
    %c0_i32_3 = arith.constant 0 : i32
    return %3, %c0_i32_2 : i32, i32
  }
  func.func @transform_1(%arg0: i32, %arg1: i32, %arg2: i32) -> (i32, i32) {
    %c0_i32 = arith.constant 0 : i32
    return %arg1, %arg2 : i32, i32
  }
  func.func @transform_2(%arg0: i32, %arg1: i32, %arg2: i32) -> (i32, i32, i32) {
    %c0_i32 = arith.constant 0 : i32
    %c0_i32_0 = arith.constant 0 : i32
    %c0_i32_1 = arith.constant 0 : i32
    return %arg0, %c0_i32, %c0_i32_0 : i32, i32, i32
  }
  func.func @transform_3(%arg0: i32, %arg1: i32, %arg2: i32) -> (i32, i32, i32) {
    %c0_i32 = arith.constant 0 : i32
    %c0_i32_0 = arith.constant 0 : i32
    %c0_i32_1 = arith.constant 0 : i32
    return %arg0, %c0_i32, %c0_i32_0 : i32, i32, i32
  }
  func.func @transform_4(%arg0: i32, %arg1: i32, %arg2: i32) -> (i32, i32) {
    %c2_i32 = arith.constant 2 : i32
    %0 = arith.cmpi eq, %arg0, %c2_i32 : i32
    %c0_i32 = arith.constant 0 : i32
    %1 = arith.select %0, %arg1, %c0_i32 : i32
    %c0_i32_0 = arith.constant 0 : i32
    %c0_i32_1 = arith.constant 0 : i32
    return %1, %c0_i32_0 : i32, i32
  }
}

</mosaic_0001>

<bundles_post_ra>
// kernel: tpu_custom_call.1
= control target key start
LH: loop header
LB: loop body
LE: loop exit
PB: predicated region body
PF: predicated region fallthrough
CT: control target
= control target key end

     0   :  { %9 = vsyncpa [#allocation6], 0  ;;  %s2420_s0 = inlined_call_operand.hbm [shape: bf16[128,128], index: 0, kind: input, shape index: {}]   ;;  %s2421_s1 = inlined_call_operand.hbm [shape: bf16[128,128], index: 1, kind: input, shape index: {}]   ;;  %s2422_s2 = inlined_call_operand.hbm [shape: bf16[3,128,128], index: 2, kind: input, shape index: {}]   ;;  %s2423_s3 = inlined_call_operand.hbm [shape: f32[3,1,128], index: 3, kind: input, shape index: {}]   ;;  %s2424_s4 = inlined_call_operand.hbm [shape: f32[128,128], index: 4, kind: output, shape index: {}]  }
   0x1   :  { %11 = vsyncpa [#allocation6 + $0x1], 0 }
   0x2   :  { %12 = vsyncpa [#allocation9], 0 }
   0x3   :  { %13 = vsyncpa [#allocation7], 0 }
   0x4   :  { %15 = vsyncpa [#allocation7 + $0x1], 0  ;;  %s2188_s15 = smov 0   ;;  %s2190_s16 = smov 0  }
   0x5   :  { %s2192_s17 = smov 0   ;;  %s2194_s18 = smov 0  }
   0x6   :  { %s2196_s19 = smov 0   ;;  %s2198_s20 = smov 0  }
   0x7 LB: > { %s1366_s21 = sadd.s32 4294967294, %s2154_s20   ;;  %p119_p0 = scmp.eq.s32.totalorder %s2154_s20, 0  ;;  %s2154_s20 = sphi %s2198_s20, %s21_s20   ;;  %s2150_s19 = sphi %s2196_s19, %s2432_s19   ;;  %s2146_s18 = sphi %s2194_s18, %s2431_s18   ;;  %s2142_s17 = sphi %s2192_s17, %s2430_s17   ;;  %s2138_s16 = sphi %s2190_s16, %s2429_s16   ;;  %s2134_s15 = sphi %s2188_s15, %s2428_s15  }
   0x8   : > { %p1881_p1 = scmp.lt.s32.totalorder %s2154_s20, 3  ;;  %s222_s22 = sand.u32 1, %s2154_s20  }
   0x9   : > { %s237_s25 = sshll.u32 %s2420_s0, 4  ;;  %s2156_s26 = smov [#allocation5]   ;;  %s238_s25 = int_to_ptr.hbm [resolvable:$true] %s237_s25 }
   0xa   : > { %s239_s27 = sshll.u32 %s2156_s26, 4  ;;  %p1867_p2 = pnand %p1881_p1, %p119_p0  ;;  %s240_s27 = int_to_ptr.vmem [resolvable:$true] %s239_s27 }
   0xb   : > { %s2229_s28 = scalar_lea.sflag [#allocation6], %s222_s22  ;;  %s2157_s29 = smov 64  }
   0xc   : > { %s2158_s30 = smov 4   ;;  %s40_s5 = sadd.s32 1, %s2150_s19 }
   0xd   : > { %1869 = dma.hbm_to_vmem [thread:$0]  (!%p1867_p2), %s238_s25, 1024, %s240_s27, %s2229_s28, %s2157_s29, %s2157_s29, %s2158_s30  }
   0xe   : > { %s111_s6 = sadd.s32 1, %s2142_s17  ;;  %p42_p3 = scmp.ge.s32.totalorder %s40_s5, 3 }
   0xf   : > { %p118_p4 = scmp.ne.s32.totalorder %s2142_s17, %s2138_s16  ;;  %s251_s7 = sand.u32 1, %s2142_s17  }
  0x10   : > { %s1584_s8 = sshll.u32 %s2150_s19, 6  ;;  %s2434_s5 = smov (%p42_p3, %s40_s5), 0 }
  0x11   : > { %p120_p5 = por %p119_p0, %p118_p4  ;;  %s1374_s9 = sshll.u32 %s251_s7, 6 }
  0x12   : > { %s108_s10 = ssub.s32 %s2150_s19, %s2434_s5  ;;  %s258_s13 = scalar_lea.hbm %s2422_s2, %s1584_s8 }
  0x13   : > { %p109_p6 = scmp.eq.s32.totalorder %s108_s10, 0  ;;  %s259_s14 = sshll.u32 %s258_s13, 4  ;;  %s260_s14 = int_to_ptr.hbm [resolvable:$true] %s259_s14 }
  0x14   : > { %s253_s22 = scalar_lea.vmem [#allocation10], %s1374_s9  ;;  %p2257_p7 = pnand %p1881_p1, %p120_p5 }
  0x15   : > { %s261_s23 = sshll.u32 %s253_s22, 4  ;;  %s2268_s26 = sadd.s32 4294967295, %s2154_s20   ;;  %s262_s23 = int_to_ptr.vmem [resolvable:$true] %s261_s23 }
  0x16   : > { %s2253_s24 = scalar_select %p109_p6, %s2142_s17, %s111_s6  }
  0x17   : > { %1872 = dma.hbm_to_vmem [thread:$0]  (!%p2257_p7), %s260_s14, 1024, %s262_s23, %s2229_s28, %s2157_s29, %s2157_s29, %s2158_s30  }
  0x18   : > { %p124_p8 = scmp.ne.s32.totalorder %s2138_s16, %s2134_s15  ;;  %p125_p9 = scmp.eq.s32.totalorder %s2268_s26, 0 }
  0x19   : > { %p1369_p10 = scmp.ge.s32.totalorder %s2154_s20, 1  ;;  %p191_p11 = scmp.lt.s32.totalorder %s2154_s20, 4 }
  0x1a   : > { %p2277_p12 = por %p125_p9, %p124_p8  ;;  %s206_s9 = sshll.u32 %s2421_s1, 4  ;;  %s207_s9 = int_to_ptr.hbm [resolvable:$true] %s206_s9 }
  0x1b   : > { %p2284_p13 = pnand %p1369_p10, %p191_p11  ;;  %s2159_s15 = smov [#allocation8]  }
  0x1c   : > { %s208_s11 = sshll.u32 %s2159_s15, 4  ;;  %s277_s14 = scalar_lea.hbm %s2423_s3, %s2150_s19  ;;  %s209_s11 = int_to_ptr.vmem [resolvable:$true] %s208_s11 }
  0x1d   : > { %p1862_p0 = pneg %p2284_p13  ;;  %s279_s22 = sshll.u32 %s277_s14, 4  ;;  %s280_s22 = int_to_ptr.hbm [resolvable:$true] %s279_s22 }
  0x1e   : > { %s274_s23 = scalar_lea.vmem [#allocation11], %s251_s7  ;;  %290 = sbr.rel (%p2284_p13) target bundleno = 680 (0x2a8), region = 36 }
  0x1f   : > { %p1863_p1 = pnand %p1862_p0, %p125_p9  ;;  %s281_s6 = sshll.u32 %s274_s23, 4  ;;  %s282_s6 = int_to_ptr.vmem [resolvable:$true] %s281_s6 }
  0x20   : > { %1875 = dma.hbm_to_vmem [thread:$0]  (!%p2257_p7), %s280_s22, 16, %s282_s6, %s2229_s28  }
  0x21   : > { %1865 = dma.hbm_to_vmem [thread:$0]  (!%p1863_p1), %s207_s9, 1024, %s209_s11, [#allocation9], %s2157_s29, %s2157_s29, %s2158_s30  }
  0x22   : > { %s292_s8 = sand.u32 (!%p2284_p13), 1, %s2268_s26  }
  0x23   : > { %s293_s15 = scalar_lea.sflag [#allocation6], %s292_s8 }
  0x24   : > { %2117 = dma.done.wait (%p125_p9), %s293_s15, 1024  }
  0x25   : > { %2119 = vsyncadd (%p125_p9), %s293_s15, 4294966272 }
  0x26   : > { %2121 = dma.done.wait (%p125_p9), [#allocation9], 1024  }
  0x27   : > { %2123 = vsyncadd (%p125_p9), [#allocation9], 4294966272  ;;  %s309_s28 = sand.u32 1, %s2138_s16  }
  0x28   : > { %s1380_s29 = sshll.u32 %s309_s28, 6 }
  0x29   : > { %s2316_s30 = scalar_lea.vmem [#allocation10], %s1380_s29 }
  0x2a   : > { %2125 = dma.done.wait (%p2277_p12), %s293_s15, 1040  }
  0x2b   : > { %2127 = vsyncadd (%p2277_p12), %s293_s15, 4294966256  ;;  %s2322_s7 = scalar_lea.vmem [#allocation11], %s309_s28  ;;  %p1381_p2 = scmp.ne.s32.totalorder %s2146_s18, 0 }
  0x2d   : > { %373 = sbr.rel (%p1381_p2) target bundleno = 243 (0xf3), region = 60 }
  0x32   : > { %v1600_v0 = vld [vmem:[%s2316_s30 + $0x38] sm:$0xff]  ;;  %v1599_v1 = vld [vmem:[%s2316_s30 + $0x30] sm:$0xff]  ;;  %v1598_v2 = vld [vmem:[%s2316_s30 + $0x28] sm:$0xff] }
  0x33   : > { %502 = vmatpush.bf16.msra.mxu0 %v1600_v0  ;;  %1774 = vmatpush.bf16.msra.mxu1 %v1600_v0  ;;  %v1597_v3 = vld [vmem:[%s2316_s30 + $0x20] sm:$0xff]  ;;  %v1596_v4 = vld [vmem:[%s2316_s30 + $0x18] sm:$0xff]  ;;  %v1595_v5 = vld [vmem:[%s2316_s30 + $0x10] sm:$0xff] }
  0x34   : > { %1775 = vmatpush.bf16.msra.mxu2 %v1600_v0  ;;  %1776 = vmatpush.bf16.msra.mxu3 %v1600_v0  ;;  %v1594_v6 = vld [vmem:[%s2316_s30 + $0x8] sm:$0xff]  ;;  %v1593_v7 = vld [vmem:[%s2316_s30] sm:$0xff]  ;;  %v1587_v9 = vld [vmem:[#allocation5 + $0x10] sm:$0xff] }
  0x35   : > { %v1585_v8 = vld [vmem:[#allocation5] sm:$0xff]  ;;  %v1591_v11 = vld [vmem:[#allocation5 + $0x30] sm:$0xff]  ;;  %v1586_v12 = vld [vmem:[#allocation5 + $0x8] sm:$0xff] }
  0x36   : > { %v1589_v10 = vld [vmem:[#allocation5 + $0x20] sm:$0xff]  ;;  %v1588_v13 = vld [vmem:[#allocation5 + $0x18] sm:$0xff]  ;;  %v1590_v14 = vld [vmem:[#allocation5 + $0x28] sm:$0xff] }
  0x37   : > { %503 = vmatpush.bf16.msra.mxu0 %v1599_v1  ;;  %1777 = vmatpush.bf16.msra.mxu1 %v1599_v1  ;;  %v1592_v15 = vld [vmem:[#allocation5 + $0x38] sm:$0xff] }
  0x38   : > { %1778 = vmatpush.bf16.msra.mxu2 %v1599_v1  ;;  %1779 = vmatpush.bf16.msra.mxu3 %v1599_v1 }
  0x3b   : > { %504 = vmatpush.bf16.msra.mxu0 %v1598_v2  ;;  %1780 = vmatpush.bf16.msra.mxu1 %v1598_v2 }
  0x3c   : > { %1781 = vmatpush.bf16.msra.mxu2 %v1598_v2  ;;  %1782 = vmatpush.bf16.msra.mxu3 %v1598_v2 }
  0x3f   : > { %505 = vmatpush.bf16.msra.mxu0 %v1597_v3  ;;  %1783 = vmatpush.bf16.msra.mxu1 %v1597_v3 }
  0x40   : > { %1784 = vmatpush.bf16.msra.mxu2 %v1597_v3  ;;  %1785 = vmatpush.bf16.msra.mxu3 %v1597_v3 }
  0x43   : > { %506 = vmatpush.bf16.msra.mxu0 %v1596_v4  ;;  %1786 = vmatpush.bf16.msra.mxu1 %v1596_v4 }
  0x44   : > { %1787 = vmatpush.bf16.msra.mxu2 %v1596_v4  ;;  %1788 = vmatpush.bf16.msra.mxu3 %v1596_v4 }
  0x47   : > { %507 = vmatpush.bf16.msra.mxu0 %v1595_v5  ;;  %1789 = vmatpush.bf16.msra.mxu1 %v1595_v5 }
  0x48   : > { %1790 = vmatpush.bf16.msra.mxu2 %v1595_v5  ;;  %1791 = vmatpush.bf16.msra.mxu3 %v1595_v5 }
  0x4b   : > { %508 = vmatpush.bf16.msra.mxu0 %v1594_v6  ;;  %1792 = vmatpush.bf16.msra.mxu1 %v1594_v6 }
  0x4c   : > { %1793 = vmatpush.bf16.msra.mxu2 %v1594_v6  ;;  %1794 = vmatpush.bf16.msra.mxu3 %v1594_v6 }
  0x4f   : > { %509 = vmatpush.bf16.msra.mxu0 %v1593_v7  ;;  %1795 = vmatpush.bf16.msra.mxu1 %v1593_v7 }
  0x50   : > { %1796 = vmatpush.bf16.msra.mxu2 %v1593_v7  ;;  %1797 = vmatpush.bf16.msra.mxu3 %v1593_v7 }
  0x52   : > { %510 = vmatmul.bf16.vlgmr.msra.gmra.mxu0 %v1585_v8  ;;  %520 = vmatmul.bf16.vlgmr.msra.gmra.mxu1 %v1587_v9 }
  0x53   : > { %530 = vmatmul.bf16.vlgmr.msra.gmra.mxu2 %v1589_v10  ;;  %540 = vmatmul.bf16.vlgmr.msra.gmra.mxu3 %v1591_v11 }
  0x62   : > { %515 = vmatmul.bf16.gmra.mxu0 %v1586_v12  ;;  %525 = vmatmul.bf16.gmra.mxu1 %v1588_v13 }
  0x63   : > { %535 = vmatmul.bf16.gmra.mxu2 %v1590_v14  ;;  %545 = vmatmul.bf16.gmra.mxu3 %v1592_v15 }
  0xcf   : > { %v511_v16 = vpop.f32.mrf.mxu0  ;;  %v521_v17 = vpop.f32.mrf.mxu1 }
  0xd6   : > { %v531_v18 = vpop.f32.mrf.mxu2  ;;  %v541_v19 = vpop.f32.mrf.mxu3 }
  0xd7   : > { %v513_v20 = vpop.f32.mrf.mxu0  ;;  %v523_v21 = vpop.f32.mrf.mxu1 }
  0xd8   : > { %v1636_v22 = vpack.c.bf16 %v513_v20, %v511_v16  ;;  %v1646_v23 = vpack.c.bf16 %v523_v21, %v521_v17 }
  0xda   : > { %1637 = vst [vmem:[#allocation3] sm:$0xff] %v1636_v22  }
  0xdb   : > { %1754 = vst [vmem:[#allocation3 + $0x10] sm:$0xff] %v1646_v23  }
  0xde   : > { %v533_v24 = vpop.f32.mrf.mxu2  ;;  %v543_v25 = vpop.f32.mrf.mxu3 }
  0xdf   : > { %v1656_v26 = vpack.c.bf16 %v533_v24, %v531_v18  ;;  %v1666_v27 = vpack.c.bf16 %v543_v25, %v541_v19  ;;  %v516_v28 = vpop.f32.mrf.mxu0  ;;  %v526_v29 = vpop.f32.mrf.mxu1 }
  0xe1   : > { %1756 = vst [vmem:[#allocation3 + $0x28] sm:$0xff] %v1656_v26  }
  0xe2   : > { %1758 = vst [vmem:[#allocation3 + $0x30] sm:$0xff] %v1666_v27  }
  0xe6   : > { %v536_v30 = vpop.f32.mrf.mxu2  ;;  %v546_v31 = vpop.f32.mrf.mxu3 }
  0xe7   : > { %v518_v32 = vpop.f32.mrf.mxu0  ;;  %v528_v33 = vpop.f32.mrf.mxu1 }
  0xe8   : > { %v1641_v34 = vpack.c.bf16 %v518_v32, %v516_v28  ;;  %v1651_v35 = vpack.c.bf16 %v528_v33, %v526_v29 }
  0xea   : > { %1753 = vst [vmem:[#allocation3 + $0x18] sm:$0xff] %v1641_v34  }
  0xeb   : > { %1755 = vst [vmem:[#allocation3 + $0x20] sm:$0xff] %v1651_v35  }
  0xee   : > { %v538_v36 = vpop.f32.mrf.mxu2  ;;  %v548_v37 = vpop.f32.mrf.mxu3 }
  0xef   : > { %v1661_v38 = vpack.c.bf16 %v538_v36, %v536_v30  ;;  %v1671_v39 = vpack.c.bf16 %v548_v37, %v546_v31 }
  0xf1   : > { %1757 = vst [vmem:[#allocation3 + $0x8] sm:$0xff] %v1661_v38  }
  0xf2   : > { %1759 = vst [vmem:[#allocation3 + $0x38] sm:$0xff] %v1671_v39  }
  0xf3 PF: > { %p1446_p3 = scmp.le.s32.totalorder %s2146_s18, 0 }
  0xf5   : > { %590 = sbr.rel (%p1446_p3) target bundleno = 443 (0x1bb), region = 64 }
  0xfa   : > { %v1616_v40 = vld [vmem:[%s2316_s30 + $0x38] sm:$0xff]  ;;  %v1615_v41 = vld [vmem:[%s2316_s30 + $0x30] sm:$0xff]  ;;  %v1614_v42 = vld [vmem:[%s2316_s30 + $0x28] sm:$0xff] }
  0xfb   : > { %723 = vmatpush.bf16.msra.mxu0 %v1616_v40  ;;  %1798 = vmatpush.bf16.msra.mxu1 %v1616_v40  ;;  %v1613_v43 = vld [vmem:[%s2316_s30 + $0x20] sm:$0xff]  ;;  %v1612_v44 = vld [vmem:[%s2316_s30 + $0x18] sm:$0xff]  ;;  %v1611_v45 = vld [vmem:[%s2316_s30 + $0x10] sm:$0xff] }
  0xfc   : > { %1799 = vmatpush.bf16.msra.mxu2 %v1616_v40  ;;  %1800 = vmatpush.bf16.msra.mxu3 %v1616_v40  ;;  %v1610_v46 = vld [vmem:[%s2316_s30 + $0x8] sm:$0xff]  ;;  %v1609_v47 = vld [vmem:[%s2316_s30] sm:$0xff]  ;;  %v1601_v48 = vld [vmem:[#allocation2 + $0x30] sm:$0xff] }
  0xfd   : > { %v1603_v49 = vld [vmem:[#allocation2 + $0x18] sm:$0xff]  ;;  %v1605_v50 = vld [vmem:[#allocation2 + $0x8] sm:$0xff]  ;;  %v1602_v52 = vld [vmem:[#allocation2] sm:$0xff] }
  0xfe   : > { %v1607_v51 = vld [vmem:[#allocation2 + $0x28] sm:$0xff]  ;;  %v1604_v53 = vld [vmem:[#allocation2 + $0x10] sm:$0xff]  ;;  %v1606_v54 = vld [vmem:[#allocation2 + $0x20] sm:$0xff] }
  0xff   : > { %724 = vmatpush.bf16.msra.mxu0 %v1615_v41  ;;  %1801 = vmatpush.bf16.msra.mxu1 %v1615_v41  ;;  %v1608_v55 = vld [vmem:[#allocation2 + $0x38] sm:$0xff] }
 0x100   : > { %1802 = vmatpush.bf16.msra.mxu2 %v1615_v41  ;;  %1803 = vmatpush.bf16.msra.mxu3 %v1615_v41 }
 0x103   : > { %725 = vmatpush.bf16.msra.mxu0 %v1614_v42  ;;  %1804 = vmatpush.bf16.msra.mxu1 %v1614_v42 }
 0x104   : > { %1805 = vmatpush.bf16.msra.mxu2 %v1614_v42  ;;  %1806 = vmatpush.bf16.msra.mxu3 %v1614_v42 }
 0x107   : > { %726 = vmatpush.bf16.msra.mxu0 %v1613_v43  ;;  %1807 = vmatpush.bf16.msra.mxu1 %v1613_v43 }
 0x108   : > { %1808 = vmatpush.bf16.msra.mxu2 %v1613_v43  ;;  %1809 = vmatpush.bf16.msra.mxu3 %v1613_v43 }
 0x10b   : > { %727 = vmatpush.bf16.msra.mxu0 %v1612_v44  ;;  %1810 = vmatpush.bf16.msra.mxu1 %v1612_v44 }
 0x10c   : > { %1811 = vmatpush.bf16.msra.mxu2 %v1612_v44  ;;  %1812 = vmatpush.bf16.msra.mxu3 %v1612_v44 }
 0x10f   : > { %728 = vmatpush.bf16.msra.mxu0 %v1611_v45  ;;  %1813 = vmatpush.bf16.msra.mxu1 %v1611_v45 }
 0x110   : > { %1814 = vmatpush.bf16.msra.mxu2 %v1611_v45  ;;  %1815 = vmatpush.bf16.msra.mxu3 %v1611_v45 }
 0x113   : > { %729 = vmatpush.bf16.msra.mxu0 %v1610_v46  ;;  %1816 = vmatpush.bf16.msra.mxu1 %v1610_v46 }
 0x114   : > { %1817 = vmatpush.bf16.msra.mxu2 %v1610_v46  ;;  %1818 = vmatpush.bf16.msra.mxu3 %v1610_v46 }
 0x117   : > { %730 = vmatpush.bf16.msra.mxu0 %v1609_v47  ;;  %1819 = vmatpush.bf16.msra.mxu1 %v1609_v47 }
 0x118   : > { %1820 = vmatpush.bf16.msra.mxu2 %v1609_v47  ;;  %1821 = vmatpush.bf16.msra.mxu3 %v1609_v47 }
 0x11a   : > { %731 = vmatmul.bf16.vlgmr.msra.gmra.mxu0 %v1601_v48  ;;  %741 = vmatmul.bf16.vlgmr.msra.gmra.mxu1 %v1603_v49 }
 0x11b   : > { %751 = vmatmul.bf16.vlgmr.msra.gmra.mxu2 %v1605_v50  ;;  %761 = vmatmul.bf16.vlgmr.msra.gmra.mxu3 %v1607_v51 }
 0x12a   : > { %736 = vmatmul.bf16.gmra.mxu0 %v1602_v52  ;;  %746 = vmatmul.bf16.gmra.mxu1 %v1604_v53 }
 0x12b   : > { %756 = vmatmul.bf16.gmra.mxu2 %v1606_v54  ;;  %766 = vmatmul.bf16.gmra.mxu3 %v1608_v55 }
 0x197   : > { %v732_v56 = vpop.f32.mrf.mxu0  ;;  %v742_v57 = vpop.f32.mrf.mxu1 }
 0x19e   : > { %v752_v58 = vpop.f32.mrf.mxu2  ;;  %v762_v59 = vpop.f32.mrf.mxu3 }
 0x19f   : > { %v734_v60 = vpop.f32.mrf.mxu0  ;;  %v744_v61 = vpop.f32.mrf.mxu1 }
 0x1a0   : > { %v1676_v62 = vpack.c.bf16 %v734_v60, %v732_v56  ;;  %v1686_v63 = vpack.c.bf16 %v744_v61, %v742_v57 }
 0x1a2   : > { %1677 = vst [vmem:[#allocation3] sm:$0xff] %v1676_v62  }
 0x1a3   : > { %1761 = vst [vmem:[#allocation3 + $0x10] sm:$0xff] %v1686_v63  }
 0x1a6   : > { %v754_v0 = vpop.f32.mrf.mxu2  ;;  %v764_v1 = vpop.f32.mrf.mxu3 }
 0x1a7   : > { %v1696_v2 = vpack.c.bf16 %v754_v0, %v752_v58  ;;  %v1706_v3 = vpack.c.bf16 %v764_v1, %v762_v59  ;;  %v737_v4 = vpop.f32.mrf.mxu0  ;;  %v747_v5 = vpop.f32.mrf.mxu1 }
 0x1a9   : > { %1763 = vst [vmem:[#allocation3 + $0x28] sm:$0xff] %v1696_v2  }
 0x1aa   : > { %1765 = vst [vmem:[#allocation3 + $0x30] sm:$0xff] %v1706_v3  }
 0x1ae   : > { %v757_v6 = vpop.f32.mrf.mxu2  ;;  %v767_v7 = vpop.f32.mrf.mxu3 }
 0x1af   : > { %v739_v8 = vpop.f32.mrf.mxu0  ;;  %v749_v9 = vpop.f32.mrf.mxu1 }
 0x1b0   : > { %v1681_v10 = vpack.c.bf16 %v739_v8, %v737_v4  ;;  %v1691_v11 = vpack.c.bf16 %v749_v9, %v747_v5 }
 0x1b2   : > { %1760 = vst [vmem:[#allocation3 + $0x18] sm:$0xff] %v1681_v10  }
 0x1b3   : > { %1762 = vst [vmem:[#allocation3 + $0x20] sm:$0xff] %v1691_v11  }
 0x1b6   : > { %v759_v12 = vpop.f32.mrf.mxu2  ;;  %v769_v13 = vpop.f32.mrf.mxu3 }
 0x1b7   : > { %v1701_v14 = vpack.c.bf16 %v759_v12, %v757_v6  ;;  %v1711_v15 = vpack.c.bf16 %v769_v13, %v767_v7 }
 0x1b9   : > { %1764 = vst [vmem:[#allocation3 + $0x8] sm:$0xff] %v1701_v14  }
 0x1ba   : > { %1766 = vst [vmem:[#allocation3 + $0x38] sm:$0xff] %v1711_v15  }
 0x1bb PF: > { %v1631_v17 = vld [vmem:[#allocation3 + $0x30] sm:$0xff]  ;;  %v1629_v19 = vld [vmem:[#allocation3 + $0x28] sm:$0xff]  ;;  %v1628_v20 = vld [vmem:[#allocation3 + $0x20] sm:$0xff]  ;;  %p1575_p4 = scmp.ge.s32.totalorder %s2146_s18, 2 }
 0x1bc   : > { %v1627_v21 = vld [vmem:[#allocation3 + $0x10] sm:$0xff]  ;;  %v1626_v22 = vld [vmem:[#allocation3 + $0x18] sm:$0xff]  ;;  %v1625_v23 = vld [vmem:[#allocation3] sm:$0xff] }
 0x1bd   : > { %v1617_v24 = vld [vmem:[#allocation8] sm:$0xff]  ;;  %v1619_v25 = vld [vmem:[#allocation8 + $0x10] sm:$0xff]  ;;  %v1618_v28 = vld [vmem:[#allocation8 + $0x8] sm:$0xff] }
 0x1be   : > { %v1621_v26 = vld [vmem:[#allocation8 + $0x20] sm:$0xff]  ;;  %v1623_v27 = vld [vmem:[#allocation8 + $0x30] sm:$0xff]  ;;  %v1620_v29 = vld [vmem:[#allocation8 + $0x18] sm:$0xff] }
 0x1bf   : > { %v1622_v30 = vld [vmem:[#allocation8 + $0x28] sm:$0xff]  ;;  %v1624_v31 = vld [vmem:[#allocation8 + $0x38] sm:$0xff]  ;;  %v2343_v32 = vld [vmem:[%s2322_s7] ss:$0 sm:$0xff] }
 0x1c0   : > { %v1630_v18 = vld [vmem:[#allocation3 + $0x8] sm:$0xff] }
 0x1c1   : > { %v1632_v16 = vld [vmem:[#allocation3 + $0x38] sm:$0xff] }
 0x1c2   : > { %974 = vmatpush.bf16.msra.mxu0 %v1632_v16  ;;  %1822 = vmatpush.bf16.msra.mxu1 %v1632_v16 }
 0x1c3   : > { %1823 = vmatpush.bf16.msra.mxu2 %v1632_v16  ;;  %1824 = vmatpush.bf16.msra.mxu3 %v1632_v16 }
 0x1c6   : > { %975 = vmatpush.bf16.msra.mxu0 %v1631_v17  ;;  %1825 = vmatpush.bf16.msra.mxu1 %v1631_v17 }
 0x1c7   : > { %1826 = vmatpush.bf16.msra.mxu2 %v1631_v17  ;;  %1827 = vmatpush.bf16.msra.mxu3 %v1631_v17 }
 0x1ca   : > { %976 = vmatpush.bf16.msra.mxu0 %v1630_v18  ;;  %1828 = vmatpush.bf16.msra.mxu1 %v1630_v18 }
 0x1cb   : > { %1829 = vmatpush.bf16.msra.mxu2 %v1630_v18  ;;  %1830 = vmatpush.bf16.msra.mxu3 %v1630_v18 }
 0x1ce   : > { %977 = vmatpush.bf16.msra.mxu0 %v1629_v19  ;;  %1831 = vmatpush.bf16.msra.mxu1 %v1629_v19 }
 0x1cf   : > { %1832 = vmatpush.bf16.msra.mxu2 %v1629_v19  ;;  %1833 = vmatpush.bf16.msra.mxu3 %v1629_v19 }
 0x1d2   : > { %978 = vmatpush.bf16.msra.mxu0 %v1628_v20  ;;  %1834 = vmatpush.bf16.msra.mxu1 %v1628_v20 }
 0x1d3   : > { %1835 = vmatpush.bf16.msra.mxu2 %v1628_v20  ;;  %1836 = vmatpush.bf16.msra.mxu3 %v1628_v20 }
 0x1d6   : > { %979 = vmatpush.bf16.msra.mxu0 %v1627_v21  ;;  %1837 = vmatpush.bf16.msra.mxu1 %v1627_v21 }
 0x1d7   : > { %1838 = vmatpush.bf16.msra.mxu2 %v1627_v21  ;;  %1839 = vmatpush.bf16.msra.mxu3 %v1627_v21 }
 0x1da   : > { %980 = vmatpush.bf16.msra.mxu0 %v1626_v22  ;;  %1840 = vmatpush.bf16.msra.mxu1 %v1626_v22 }
 0x1db   : > { %1841 = vmatpush.bf16.msra.mxu2 %v1626_v22  ;;  %1842 = vmatpush.bf16.msra.mxu3 %v1626_v22 }
 0x1de   : > { %981 = vmatpush.bf16.msra.mxu0 %v1625_v23  ;;  %1843 = vmatpush.bf16.msra.mxu1 %v1625_v23 }
 0x1df   : > { %1844 = vmatpush.bf16.msra.mxu2 %v1625_v23  ;;  %1845 = vmatpush.bf16.msra.mxu3 %v1625_v23 }
 0x1e1   : > { %982 = vmatmul.bf16.vlgmr.msra.gmra.mxu0 %v1617_v24  ;;  %992 = vmatmul.bf16.vlgmr.msra.gmra.mxu1 %v1619_v25 }
 0x1e2   : > { %1002 = vmatmul.bf16.vlgmr.msra.gmra.mxu2 %v1621_v26  ;;  %1012 = vmatmul.bf16.vlgmr.msra.gmra.mxu3 %v1623_v27 }
 0x1f1   : > { %987 = vmatmul.bf16.gmra.mxu0 %v1618_v28  ;;  %997 = vmatmul.bf16.gmra.mxu1 %v1620_v29 }
 0x1f2   : > { %1007 = vmatmul.bf16.gmra.mxu2 %v1622_v30  ;;  %1017 = vmatmul.bf16.gmra.mxu3 %v1624_v31 }
 0x25e   : > { %v983_v33 = vpop.f32.mrf.mxu0  ;;  %v993_v34 = vpop.f32.mrf.mxu1 }
 0x25f   : > { %v1078_v35 = vadd.f32 %v2343_v32, %v983_v33  ;;  %v1082_v36 = vadd.f32 %v2343_v32, %v993_v34 }
 0x261   : > { %vm1094_vm0 = vcmp.ge.f32.partialorder %v1078_v35, 0.0  ;;  %v1110_v37 = vmul.f32 0.25, %v1078_v35  ;;  %vm1098_vm1 = vcmp.ge.f32.partialorder %v1082_v36, 0.0  ;;  %v1114_v38 = vmul.f32 0.25, %v1082_v36 }
 0x263   : > { %v2347_v39 = vsel %vm1094_vm0, %v1078_v35, %v1110_v37  ;;  %v2349_v40 = vsel %vm1098_vm1, %v1082_v36, %v1114_v38 }
 0x265   : > { %v1003_v41 = vpop.f32.mrf.mxu2  ;;  %v1013_v42 = vpop.f32.mrf.mxu3 }
 0x266   : > { %v1086_v43 = vadd.f32 %v2343_v32, %v1003_v41  ;;  %v1090_v44 = vadd.f32 %v2343_v32, %v1013_v42  ;;  %v985_v45 = vpop.f32.mrf.mxu0  ;;  %v995_v46 = vpop.f32.mrf.mxu1 }
 0x267   : > { %v1079_v47 = vadd.f32 %v2343_v32, %v985_v45  ;;  %v1083_v48 = vadd.f32 %v2343_v32, %v995_v46 }
 0x268   : > { %vm1102_vm2 = vcmp.ge.f32.partialorder %v1086_v43, 0.0  ;;  %v1118_v49 = vmul.f32 0.25, %v1086_v43  ;;  %vm1106_vm3 = vcmp.ge.f32.partialorder %v1090_v44, 0.0  ;;  %v1122_v50 = vmul.f32 0.25, %v1090_v44 }
 0x269   : > { %vm1095_vm4 = vcmp.ge.f32.partialorder %v1079_v47, 0.0  ;;  %v1111_v51 = vmul.f32 0.25, %v1079_v47  ;;  %vm1099_vm5 = vcmp.ge.f32.partialorder %v1083_v48, 0.0  ;;  %v1115_v52 = vmul.f32 0.25, %v1083_v48 }
 0x26a   : > { %v2355_v53 = vsel %vm1102_vm2, %v1086_v43, %v1118_v49  ;;  %v2357_v54 = vsel %vm1106_vm3, %v1090_v44, %v1122_v50 }
 0x26b   : > { %v2359_v55 = vsel %vm1095_vm4, %v1079_v47, %v1111_v51  ;;  %v2361_v56 = vsel %vm1099_vm5, %v1083_v48, %v1115_v52 }
 0x26d   : > { %v1005_v57 = vpop.f32.mrf.mxu2  ;;  %v1015_v58 = vpop.f32.mrf.mxu3 }
 0x26e   : > { %v1087_v59 = vadd.f32 %v2343_v32, %v1005_v57  ;;  %v1091_v60 = vadd.f32 %v2343_v32, %v1015_v58  ;;  %v988_v61 = vpop.f32.mrf.mxu0  ;;  %v998_v62 = vpop.f32.mrf.mxu1 }
 0x26f   : > { %v1080_v63 = vadd.f32 %v2343_v32, %v988_v61  ;;  %v1084_v0 = vadd.f32 %v2343_v32, %v998_v62 }
 0x270   : > { %vm1103_vm6 = vcmp.ge.f32.partialorder %v1087_v59, 0.0  ;;  %v1119_v1 = vmul.f32 0.25, %v1087_v59  ;;  %vm1107_vm7 = vcmp.ge.f32.partialorder %v1091_v60, 0.0  ;;  %v1123_v2 = vmul.f32 0.25, %v1091_v60 }
 0x271   : > { %vm1096_vm8 = vcmp.ge.f32.partialorder %v1080_v63, 0.0  ;;  %v1112_v3 = vmul.f32 0.25, %v1080_v63  ;;  %vm1100_vm9 = vcmp.ge.f32.partialorder %v1084_v0, 0.0  ;;  %v1116_v4 = vmul.f32 0.25, %v1084_v0 }
 0x272   : > { %v2367_v5 = vsel %vm1103_vm6, %v1087_v59, %v1119_v1  ;;  %v2369_v6 = vsel %vm1107_vm7, %v1091_v60, %v1123_v2 }
 0x273   : > { %v1128_v7 = vsel %vm1096_vm8, %v1080_v63, %v1112_v3  ;;  %v1132_v8 = vsel %vm1100_vm9, %v1084_v0, %v1116_v4 }
 0x275   : > { %v1008_v9 = vpop.f32.mrf.mxu2  ;;  %v1018_v10 = vpop.f32.mrf.mxu3 }
 0x276   : > { %v1088_v11 = vadd.f32 %v2343_v32, %v1008_v9  ;;  %v1092_v12 = vadd.f32 %v2343_v32, %v1018_v10  ;;  %v990_v13 = vpop.f32.mrf.mxu0  ;;  %v1000_v14 = vpop.f32.mrf.mxu1 }
 0x277   : > { %v1081_v15 = vadd.f32 %v2343_v32, %v990_v13  ;;  %v1085_v16 = vadd.f32 %v2343_v32, %v1000_v14 }
 0x278   : > { %vm1104_vm10 = vcmp.ge.f32.partialorder %v1088_v11, 0.0  ;;  %v1120_v17 = vmul.f32 0.25, %v1088_v11  ;;  %vm1108_vm11 = vcmp.ge.f32.partialorder %v1092_v12, 0.0  ;;  %v1124_v18 = vmul.f32 0.25, %v1092_v12 }
 0x279   : > { %vm1097_vm12 = vcmp.ge.f32.partialorder %v1081_v15, 0.0  ;;  %v1113_v19 = vmul.f32 0.25, %v1081_v15  ;;  %vm1101_vm13 = vcmp.ge.f32.partialorder %v1085_v16, 0.0  ;;  %v1117_v20 = vmul.f32 0.25, %v1085_v16 }
 0x27a   : > { %v1136_v21 = vsel %vm1104_vm10, %v1088_v11, %v1120_v17  ;;  %v1140_v22 = vsel %vm1108_vm11, %v1092_v12, %v1124_v18 }
 0x27b   : > { %v1129_v23 = vsel %vm1097_vm12, %v1081_v15, %v1113_v19  ;;  %v1133_v24 = vsel %vm1101_vm13, %v1085_v16, %v1117_v20 }
 0x27d   : > { %v1010_v25 = vpop.f32.mrf.mxu2  ;;  %v1020_v26 = vpop.f32.mrf.mxu3 }
 0x27e   : > { %v1089_v27 = vadd.f32 %v2343_v32, %v1010_v25  ;;  %v1093_v28 = vadd.f32 %v2343_v32, %v1020_v26  ;;  %1145 = sbr.rel (%p1575_p4) target bundleno = 653 (0x28d), region = 76 }
 0x280   : > { %vm1105_vm14 = vcmp.ge.f32.partialorder %v1089_v27, 0.0  ;;  %v1121_v29 = vmul.f32 0.25, %v1089_v27  ;;  %vm1109_vm15 = vcmp.ge.f32.partialorder %v1093_v28, 0.0  ;;  %v1125_v30 = vmul.f32 0.25, %v1093_v28 }
 0x282   : > { %v1137_v31 = vsel %vm1105_vm14, %v1089_v27, %v1121_v29  ;;  %v1141_v33 = vsel %vm1109_vm15, %v1093_v28, %v1125_v30 }
 0x283   : > { %v1716_v34 = vpack.c.bf16 %v2359_v55, %v2347_v39  ;;  %v1721_v35 = vpack.c.bf16 %v1129_v23, %v1128_v7  ;;  %v1726_v36 = vpack.c.bf16 %v2361_v56, %v2349_v40  ;;  %v1731_v37 = vpack.c.bf16 %v1133_v24, %v1132_v8 }
 0x284   : > { %v1736_v32 = vpack.c.bf16 %v2367_v5, %v2355_v53  ;;  %v1741_v38 = vpack.c.bf16 %v1137_v31, %v1136_v21  ;;  %v1746_v41 = vpack.c.bf16 %v2369_v6, %v2357_v54  ;;  %v1751_v42 = vpack.c.bf16 %v1141_v33, %v1140_v22 }
 0x285   : > { %1717 = vst [vmem:[#allocation2 + $0x30] sm:$0xff] %v1716_v34  }
 0x286   : > { %1767 = vst [vmem:[#allocation2] sm:$0xff] %v1721_v35  }
 0x287   : > { %1768 = vst [vmem:[#allocation2 + $0x18] sm:$0xff] %v1726_v36  }
 0x288   : > { %1769 = vst [vmem:[#allocation2 + $0x10] sm:$0xff] %v1731_v37  }
 0x289   : > { %1770 = vst [vmem:[#allocation2 + $0x8] sm:$0xff] %v1736_v32  }
 0x28a   : > { %1771 = vst [vmem:[#allocation2 + $0x20] sm:$0xff] %v1741_v38  }
 0x28b   : > { %1772 = vst [vmem:[#allocation2 + $0x28] sm:$0xff] %v1746_v41  }
 0x28c   : > { %1773 = vst [vmem:[#allocation2 + $0x38] sm:$0xff] %v1751_v42  }
 0x28d PF: > { %p1576_p5 = scmp.ne.s32.totalorder %s2146_s18, 2 }
 0x28f   : > { %1186 = sbr.rel (%p1576_p5) target bundleno = 676 (0x2a4), region = 80 }
 0x294   : > { %1187 = vst [vmem:[#allocation12] sm:$0xff] %v2347_v39 }
 0x295   : > { %1188 = vst [vmem:[#allocation12 + $0x8] sm:$0xff] %v2359_v55 }
 0x296   : > { %1189 = vst [vmem:[#allocation12 + $0x10] sm:$0xff] %v1128_v7 }
 0x297   : > { %1190 = vst [vmem:[#allocation12 + $0x18] sm:$0xff] %v1129_v23 }
 0x298   : > { %1191 = vst [vmem:[#allocation12 + $0x20] sm:$0xff] %v2349_v40 }
 0x299   : > { %1192 = vst [vmem:[#allocation12 + $0x28] sm:$0xff] %v2361_v56 }
 0x29a   : > { %1193 = vst [vmem:[#allocation12 + $0x30] sm:$0xff] %v1132_v8 }
 0x29b   : > { %1194 = vst [vmem:[#allocation12 + $0x38] sm:$0xff] %v1133_v24 }
 0x29c   : > { %1195 = vst [vmem:[#allocation12 + $0x40] sm:$0xff] %v2355_v53 }
 0x29d   : > { %1196 = vst [vmem:[#allocation12 + $0x48] sm:$0xff] %v2367_v5 }
 0x29e   : > { %1197 = vst [vmem:[#allocation12 + $0x50] sm:$0xff] %v1136_v21 }
 0x29f   : > { %1198 = vst [vmem:[#allocation12 + $0x58] sm:$0xff] %v1137_v31 }
 0x2a0   : > { %1199 = vst [vmem:[#allocation12 + $0x60] sm:$0xff] %v2357_v54 }
 0x2a1   : > { %1200 = vst [vmem:[#allocation12 + $0x68] sm:$0xff] %v2369_v6 }
 0x2a2   : > { %1201 = vst [vmem:[#allocation12 + $0x70] sm:$0xff] %v1140_v22 }
 0x2a3   : > { %1202 = vst [vmem:[#allocation12 + $0x78] sm:$0xff] %v1141_v33 }
 0x2a4 PF: > { %p1885_p6 = scmp.eq.s32.totalorder %s2268_s26, 2  ;;  %s1220_s27 = sshll.u32 %s2424_s4, 4  ;;  %s1221_s27 = int_to_ptr.hbm [resolvable:$true] %s1220_s27 }
 0x2a5   : > { %s2160_s9 = smov [#allocation12]   ;;  %s2161_s11 = smov 128  }
 0x2a6   : > { %s1218_s10 = sshll.u32 %s2160_s9, 4  ;;  %s2162_s12 = smov 8   ;;  %s1219_s10 = int_to_ptr.vmem [resolvable:$true] %s1218_s10 }
 0x2a7   : > { %1859 = dma.vmem_to_hbm [thread:$0]  (%p1885_p6), %s1219_s10, 2048, %s1221_s27, [#allocation7], %s2161_s11, %s2161_s11, %s2162_s12  }
 0x2a8 PF: > { %p1886_p7 = scmp.ge.s32.totalorder %s2154_s20, 2  ;;  %p1887_p8 = scmp.eq.s32.totalorder %s1366_s21, 2 }
 0x2aa   : > { %p1877_p9 = pnand %p1887_p8, %p1886_p7 }
 0x2ac   : > { %p1878_p10 = pneg %p1877_p9 }
 0x2ae   : > { %2129 = dma.done.wait (%p1878_p10), [#allocation7], 2048  }
 0x2af   : > { %2131 = vsyncadd (%p1878_p10), [#allocation7], 4294965248  ;;  %s21_s20 = sadd.s32 1, %s2154_s20   ;;  %s2428_s15 = smov %s2138_s16 }
 0x2b0   : > { %p18_p11 = scmp.ge.s32.totalorder %s21_s20, 5   ;;  %s2429_s16 = smov %s2142_s17 }
 0x2b1   : > { %s2430_s17 = smov %s2253_s24  ;;  %s2431_s18 = smov %s2150_s19 }
 0x2b2   : > { %s2432_s19 = smov %s2434_s5  ;;  %20 = sbr.rel (!%p18_p11) target bundleno = 7 (0x7), region = 141 }
 0x2b7   :  { %1242 = vsyncpa [#allocation6], 1 }
 0x2b8   :  { %1244 = vsyncpa [#allocation6 + $0x1], 1 }
 0x2b9   :  { %1245 = vsyncpa [#allocation9], 1 }
 0x2ba   :  { %1246 = vsyncpa [#allocation7], 1 }
 0x2bb   :  { %1248 = vsyncpa [#allocation7 + $0x1], 1 }

</bundles_post_ra>
